<compile_context>
chip_gen: v5e
topology: v5e:2x2
jax: 0.10.0
libtpu: 0.0.40
codegen_flags: <defaults>
</compile_context>

<pallas_src>
import functools

import jax
import jax.numpy as jnp
from jax import lax
from jax.experimental import pallas as pl
from jax.experimental.pallas import tpu as pltpu


def _round_up(n, m):
    return ((n + m - 1) // m) * m


def _cdiv(a, b):
    return (a + b - 1) // b


def chessnet_kernel(x_ref, w1_ref, b1_ref, w2_ref, b2_ref, w3_ref, b3_ref, o_ref):
    # x tile: (TB, 64).  Cast to bf16 for the MXU (no-op if the producer already
    # streams bf16); accumulate in f32.
    x = x_ref[...].astype(jnp.bfloat16)

    # fc1 + relu:  (TB, 64) @ (64, 128) -> (TB, 128)
    h1 = jnp.dot(x, w1_ref[...], preferred_element_type=jnp.float32)
    h1 = jnp.maximum(h1 + b1_ref[...], 0.0)

    # fc2 + relu:  (TB, 128) @ (128, 64) -> (TB, 64)
    h2 = jnp.dot(h1.astype(jnp.bfloat16), w2_ref[...],
                 preferred_element_type=jnp.float32)
    h2 = jnp.maximum(h2 + b2_ref[...], 0.0)

    # fc3 + tanh, emitted lane-dense:  y[r, t] = sum_d w3[r, d] * h2[t, d].
    # w3_ref holds the fc3 weight row replicated to 8 sublanes (MXU-friendly M);
    # a transposed-RHS contraction gives the (8, TB) result already lane-major.
    y = lax.dot_general(w3_ref[...], h2.astype(jnp.bfloat16),
                        dimension_numbers=(((1,), (1,)), ((), ())),
                        preferred_element_type=jnp.float32)          # (8, TB)
    o_ref[...] = jnp.tanh(y[0:1, :] + b3_ref[0, 0]).astype(o_ref.dtype)


@functools.partial(jax.jit, static_argnames=("tb",))
def chessnet_forward(x, params, *, tb=4096):
    """x: (B, 64) float32 or bfloat16.  Returns (B, 1) float32."""
    w1, b1, w2, b2, w3, b3 = params
    B = x.shape[0]

    # ---- batch tiling (TB always a multiple of 128) --------------------------
    tb = max(128, _round_up(tb, 128))
    nsteps = _cdiv(B, tb)
    if nsteps == 1 and B > 128:
        nsteps = 2                      # give both v7x TensorCores a tile
    TB = _round_up(_cdiv(B, nsteps), 128)
    Bp = _round_up(B, TB)
    grid = Bp // TB
    if Bp != B:
        x = jnp.pad(x, ((0, Bp - B), (0, 0)))

    # ---- params: MXU weights pre-cast to bf16; fc3 row padded to 8 sublanes --
    w1b = w1.astype(jnp.bfloat16)                                    # (64, 128)
    w2b = w2.astype(jnp.bfloat16)                                    # (128, 64)
    w3b = jnp.broadcast_to(w3.reshape(1, 64), (8, 64)).astype(jnp.bfloat16)
    b3s = b3.reshape(1, 1).astype(jnp.float32)                       # SMEM scalar

    def resident(a):
        # Full-shape block, same block index every grid step -> stays in VMEM.
        return pl.BlockSpec(a.shape, lambda i: (0,) * a.ndim)

    # Default scoped VMEM (16 MiB on v5e) is plenty at TB<=4096; give headroom
    # only when a larger tile is requested.
    vmem_limit = 48 * 1024 * 1024 if TB > 4096 else None

    out = pl.pallas_call(
        chessnet_kernel,
        out_shape=jax.ShapeDtypeStruct((1, Bp), jnp.float32),
        grid=(grid,),
        in_specs=[
            pl.BlockSpec((TB, 64), lambda i: (i, 0)),                # x: streamed
            resident(w1b), resident(b1),
            resident(w2b), resident(b2),
            resident(w3b),
            pl.BlockSpec(memory_space=pltpu.MemorySpace.SMEM),       # b3 scalar
        ],
        out_specs=pl.BlockSpec((1, TB), lambda i: (0, i)),           # lane-dense
        compiler_params=pltpu.CompilerParams(
            dimension_semantics=("parallel",),
            vmem_limit_bytes=vmem_limit,
        ),
    )(x, w1b, b1, w2b, b2, w3b, b3s)

    return out.reshape(-1, 1)[:B]


def init_params(key):
    """Deterministic init mimicking nn.Linear's U(-1/sqrt(fan_in), 1/sqrt(fan_in))."""
    def linear(key, fan_in, fan_out):
        kw, kb = jax.random.split(key)
        bound = 1.0 / jnp.sqrt(float(fan_in))
        w = jax.random.uniform(kw, (fan_in, fan_out), jnp.float32, -bound, bound)
        b = jax.random.uniform(kb, (1, fan_out), jnp.float32, -bound, bound)
        return w, b

    k1, k2, k3 = jax.random.split(key, 3)
    w1, b1 = linear(k1, 64, 128)
    w2, b2 = linear(k2, 128, 64)
    w3, b3 = linear(k3, 64, 1)
    return w1, b1, w2, b2, w3, b3


def reference_forward(x, params):
    w1, b1, w2, b2, w3, b3 = params
    h1 = jnp.maximum(x @ w1 + b1, 0.0)
    h2 = jnp.maximum(h1 @ w2 + b2, 0.0)
    return jnp.tanh(h2 @ w3 + b3)


if __name__ == "__main__":
    key = jax.random.PRNGKey(0)
    kx1, kx2, kp = jax.random.split(key, 3)
    params = init_params(kp)

    # Single-tile path (grid = 1): batch of 8 flattened 8x8 boards.
    B1 = 8
    x1 = jax.random.normal(kx1, (B1, 64), jnp.float32)
    out1 = jax.block_until_ready(chessnet_forward(x1, params))
    ref1 = reference_forward(x1, params)
    assert out1.shape == (B1, 1)
    # Tolerance loosened vs. exact f32 because MXU inputs are bf16.
    assert jnp.allclose(out1, ref1, atol=2e-2, rtol=2e-2), "mismatch vs reference (B=8)"

    # Multi-tile path (grid = 2, ragged tail padding): B = 200.
    B2 = 200
    x2 = jax.random.normal(kx2, (B2, 64), jnp.float32)
    out2 = jax.block_until_ready(chessnet_forward(x2, params))
    ref2 = reference_forward(x2, params)
    assert out2.shape == (B2, 1)
    assert jnp.allclose(out2, ref2, atol=2e-2, rtol=2e-2), "mismatch vs reference (B=200)"

    # bf16-producer path: the kernel consumes bf16 x directly (halves the HBM stream).
    x3 = x2.astype(jnp.bfloat16)
    out3 = jax.block_until_ready(chessnet_forward(x3, params))
    ref3 = reference_forward(x3.astype(jnp.float32), params)
    assert jnp.allclose(out3, ref3, atol=3e-2, rtol=3e-2), "mismatch vs reference (bf16 x)"

    print("KERNEL_OK")
</pallas_src>

<mosaic_0001>
module attributes {stable_mosaic.version = 11 : i64} {
  func.func @chessnet_kernel(%arg0: i32, %arg1: memref<128x64xf32, #tpu.memory_space<vmem>>, %arg2: memref<64x128xbf16, #tpu.memory_space<vmem>>, %arg3: memref<1x128xf32, #tpu.memory_space<vmem>>, %arg4: memref<128x64xbf16, #tpu.memory_space<vmem>>, %arg5: memref<1x64xf32, #tpu.memory_space<vmem>>, %arg6: memref<8x64xbf16, #tpu.memory_space<vmem>>, %arg7: memref<1x1xf32, #tpu.memory_space<smem>>, %arg8: memref<1x128xf32, #tpu.memory_space<vmem>>) attributes {dimension_semantics = [#tpu.dimension_semantics<parallel>], iteration_bounds = array<i64: 1>, scalar_prefetch = 0 : i64, scratch_operands = 0 : i64, tpu.core_type = #tpu.core_type<tc>, window_params = [{transform_indices = @transform_0, window_bounds = array<i64: 128, 64>}, {pipeline_mode = #tpu.pipeline_mode<synchronous>, transform_indices = @transform_1, window_bounds = array<i64: 64, 128>}, {pipeline_mode = #tpu.pipeline_mode<synchronous>, transform_indices = @transform_2, window_bounds = array<i64: 1, 128>}, {pipeline_mode = #tpu.pipeline_mode<synchronous>, transform_indices = @transform_3, window_bounds = array<i64: 128, 64>}, {pipeline_mode = #tpu.pipeline_mode<synchronous>, transform_indices = @transform_4, window_bounds = array<i64: 1, 64>}, {pipeline_mode = #tpu.pipeline_mode<synchronous>, transform_indices = @transform_5, window_bounds = array<i64: 8, 64>}, {transform_indices = @transform_6, window_bounds = array<i64: 1, 1>}, {transform_indices = @transform_7, window_bounds = array<i64: 1, 128>}]} {
    %c0 = arith.constant 0 : index
    %c0_0 = arith.constant 0 : index
    %0 = vector.load %arg1[%c0, %c0_0] : memref<128x64xf32, #tpu.memory_space<vmem>>, vector<128x64xf32>
    %1 = arith.truncf %0 : vector<128x64xf32> to vector<128x64xbf16>
    %c0_1 = arith.constant 0 : index
    %c0_2 = arith.constant 0 : index
    %2 = vector.load %arg2[%c0_1, %c0_2] : memref<64x128xbf16, #tpu.memory_space<vmem>>, vector<64x128xbf16>
    %cst = arith.constant dense<0.000000e+00> : vector<128x128xf32>
    %3 = tpu.matmul %1, %2, %cst {dimension_numbers = #tpu.dot_dimension_numbers<[1], [0], [0], [1], [0, 0, 1, 1], [], []>} : vector<128x64xbf16>, vector<64x128xbf16>, vector<128x128xf32> -> vector<128x128xf32>
    %c0_3 = arith.constant 0 : index
    %c0_4 = arith.constant 0 : index
    %4 = vector.load %arg3[%c0_3, %c0_4] : memref<1x128xf32, #tpu.memory_space<vmem>>, vector<1x128xf32>
    %5 = vector.broadcast %4 : vector<1x128xf32> to vector<128x128xf32>
    %6 = arith.addf %3, %5 : vector<128x128xf32>
    %cst_5 = arith.constant 0.000000e+00 : f32
    %7 = vector.broadcast %cst_5 : f32 to vector<128x128xf32>
    %8 = arith.maximumf %6, %7 : vector<128x128xf32>
    %9 = arith.truncf %8 : vector<128x128xf32> to vector<128x128xbf16>
    %c0_6 = arith.constant 0 : index
    %c0_7 = arith.constant 0 : index
    %10 = vector.load %arg4[%c0_6, %c0_7] : memref<128x64xbf16, #tpu.memory_space<vmem>>, vector<128x64xbf16>
    %cst_8 = arith.constant dense<0.000000e+00> : vector<128x64xf32>
    %11 = tpu.matmul %9, %10, %cst_8 {dimension_numbers = #tpu.dot_dimension_numbers<[1], [0], [0], [1], [0, 0, 1, 1], [], []>} : vector<128x128xbf16>, vector<128x64xbf16>, vector<128x64xf32> -> vector<128x64xf32>
    %c0_9 = arith.constant 0 : index
    %c0_10 = arith.constant 0 : index
    %12 = vector.load %arg5[%c0_9, %c0_10] : memref<1x64xf32, #tpu.memory_space<vmem>>, vector<1x64xf32>
    %13 = vector.broadcast %12 : vector<1x64xf32> to vector<128x64xf32>
    %14 = arith.addf %11, %13 : vector<128x64xf32>
    %cst_11 = arith.constant 0.000000e+00 : f32
    %15 = vector.broadcast %cst_11 : f32 to vector<128x64xf32>
    %16 = arith.maximumf %14, %15 : vector<128x64xf32>
    %c0_12 = arith.constant 0 : index
    %c0_13 = arith.constant 0 : index
    %17 = vector.load %arg6[%c0_12, %c0_13] : memref<8x64xbf16, #tpu.memory_space<vmem>>, vector<8x64xbf16>
    %18 = arith.truncf %16 : vector<128x64xf32> to vector<128x64xbf16>
    %cst_14 = arith.constant dense<0.000000e+00> : vector<8x128xf32>
    %19 = tpu.matmul %17, %18, %cst_14 {dimension_numbers = #tpu.dot_dimension_numbers<[1], [1], [0], [0], [0, 0, 1, 0], [], []>} : vector<8x64xbf16>, vector<128x64xbf16>, vector<8x128xf32> -> vector<8x128xf32>
    %20 = vector.extract_strided_slice %19 {offsets = [0, 0], sizes = [1, 128], strides = [1, 1]} : vector<8x128xf32> to vector<1x128xf32>
    %c0_15 = arith.constant 0 : index
    %c0_16 = arith.constant 0 : index
    %21 = memref.load %arg7[%c0_15, %c0_16] : memref<1x1xf32, #tpu.memory_space<smem>>
    %22 = vector.broadcast %21 : f32 to vector<1x128xf32>
    %23 = arith.addf %20, %22 : vector<1x128xf32>
    %24 = math.tanh %23 : vector<1x128xf32>
    %c0_17 = arith.constant 0 : index
    %c0_18 = arith.constant 0 : index
    %25 = vector.load %arg8[%c0_17, %c0_18] : memref<1x128xf32, #tpu.memory_space<vmem>>, vector<1x128xf32>
    tpu.vector_store %arg8[%c0_17, %c0_18], %24 {strides = array<i32>} : memref<1x128xf32, #tpu.memory_space<vmem>>, vector<1x128xf32>,
    return
  }
  func.func @transform_0(%arg0: i32) -> (i32, i32) {
    %c0_i32 = arith.constant 0 : i32
    %c0_i32_0 = arith.constant 0 : i32
    return %arg0, %c0_i32 : i32, i32
  }
  func.func @transform_1(%arg0: i32) -> (i32, i32) {
    %c0_i32 = arith.constant 0 : i32
    %c0_i32_0 = arith.constant 0 : i32
    %c0_i32_1 = arith.constant 0 : i32
    return %c0_i32, %c0_i32_0 : i32, i32
  }
  func.func @transform_2(%arg0: i32) -> (i32, i32) {
    %c0_i32 = arith.constant 0 : i32
    %c0_i32_0 = arith.constant 0 : i32
    %c0_i32_1 = arith.constant 0 : i32
    return %c0_i32, %c0_i32_0 : i32, i32
  }
  func.func @transform_3(%arg0: i32) -> (i32, i32) {
    %c0_i32 = arith.constant 0 : i32
    %c0_i32_0 = arith.constant 0 : i32
    %c0_i32_1 = arith.constant 0 : i32
    return %c0_i32, %c0_i32_0 : i32, i32
  }
  func.func @transform_4(%arg0: i32) -> (i32, i32) {
    %c0_i32 = arith.constant 0 : i32
    %c0_i32_0 = arith.constant 0 : i32
    %c0_i32_1 = arith.constant 0 : i32
    return %c0_i32, %c0_i32_0 : i32, i32
  }
  func.func @transform_5(%arg0: i32) -> (i32, i32) {
    %c0_i32 = arith.constant 0 : i32
    %c0_i32_0 = arith.constant 0 : i32
    %c0_i32_1 = arith.constant 0 : i32
    return %c0_i32, %c0_i32_0 : i32, i32
  }
  func.func @transform_6(%arg0: i32) -> (i32, i32) {
    %c0_i32 = arith.constant 0 : i32
    %c0_i32_0 = arith.constant 0 : i32
    %c0_i32_1 = arith.constant 0 : i32
    return %c0_i32, %c0_i32_0 : i32, i32
  }
  func.func @transform_7(%arg0: i32) -> (i32, i32) {
    %c0_i32 = arith.constant 0 : i32
    %c0_i32_0 = arith.constant 0 : i32
    return %c0_i32, %arg0 : i32, i32
  }
}

</mosaic_0001>

<bundles_post_ra>
// kernel: chessnet_forward.1
= control target key start
LH: loop header
LB: loop body
LE: loop exit
PB: predicated region body
PF: predicated region fallthrough
CT: control target
= control target key end

     0   :  { %vm88_vm0 = vcmask 523264   ;;  %s617_s1 = inlined_call_operand.vmem [shape: bf16[64,128], index: 1, kind: input, shape index: {}]   ;;  %s618_s2 = inlined_call_operand.vmem [shape: f32[1,128], index: 2, kind: input, shape index: {}]   ;;  %s619_s0 = inlined_call_operand.vmem [shape: f32[128,64], index: 0, kind: input, shape index: {}]   ;;  %s620_s3 = inlined_call_operand.vmem [shape: bf16[128,64], index: 3, kind: input, shape index: {}]   ;;  %s621_s4 = inlined_call_operand.vmem [shape: f32[1,64], index: 4, kind: input, shape index: {}]   ;;  %s622_s5 = inlined_call_operand.vmem [shape: bf16[8,64], index: 5, kind: input, shape index: {}]   ;;  %s623_s6 = inlined_call_operand.<no memory space> [shape: f32[1,1], index: 6, kind: input, shape index: {}]   ;;  %s624_s7 = inlined_call_operand.vmem [shape: f32[1,128], index: 7, kind: output, shape index: {}]  }
   0x1   :  { %v437_v0 = vld [vmem:[%s617_s1 + $0x18] sm:$0xff]  ;;  %v436_v1 = vld [vmem:[%s617_s1 + $0x10] sm:$0xff]  ;;  %v435_v2 = vld [vmem:[%s617_s1 + $0x8] sm:$0xff] }
   0x2   :  { %117 = vmatpush.bf16.msra.mxu0 %v437_v0  ;;  %v434_v3 = vld [vmem:[%s617_s1] sm:$0xff]  ;;  %v29_v5 = vld [vmem:[%s619_s0 + $0x8] sm:$0xff]  ;;  %v30_v7 = vld [vmem:[%s619_s0 + $0x10] sm:$0xff] }
   0x3   :  { %v28_v4 = vld [vmem:[%s619_s0] sm:$0xff]  ;;  %v31_v8 = vld [vmem:[%s619_s0 + $0x18] sm:$0xff]  ;;  %v33_v11 = vld [vmem:[%s619_s0 + $0x28] sm:$0xff] }
   0x4   :  { %v44_v6 = vpack.c.bf16 %v29_v5, %v28_v4  ;;  %v45_v9 = vpack.c.bf16 %v31_v8, %v30_v7  ;;  %v32_v10 = vld [vmem:[%s619_s0 + $0x20] sm:$0xff]  ;;  %v34_v13 = vld [vmem:[%s619_s0 + $0x30] sm:$0xff]  ;;  %v35_v14 = vld [vmem:[%s619_s0 + $0x38] sm:$0xff] }
   0x5   :  { %v46_v12 = vpack.c.bf16 %v33_v11, %v32_v10  ;;  %v47_v15 = vpack.c.bf16 %v35_v14, %v34_v13  ;;  %v36_v16 = vld [vmem:[%s619_s0 + $0x40] sm:$0xff]  ;;  %v37_v17 = vld [vmem:[%s619_s0 + $0x48] sm:$0xff]  ;;  %v445_v19 = vld [vmem:[%s620_s3 + $0x38] sm:$0xff] }
   0x6   :  { %118 = vmatpush.bf16.msra.mxu0 %v436_v1  ;;  %v48_v18 = vpack.c.bf16 %v37_v17, %v36_v16  ;;  %254 = vmatpush.bf16.msra.mxu1 %v445_v19  ;;  %v38_v20 = vld [vmem:[%s619_s0 + $0x50] sm:$0xff]  ;;  %v39_v21 = vld [vmem:[%s619_s0 + $0x58] sm:$0xff]  ;;  %v443_v24 = vld [vmem:[%s620_s3 + $0x28] sm:$0xff] }
   0x7   :  { %446 = vmatpush.bf16.msra.mxu3 %v445_v19  ;;  %v49_v22 = vpack.c.bf16 %v39_v21, %v38_v20  ;;  %v444_v23 = vld [vmem:[%s620_s3 + $0x30] sm:$0xff]  ;;  %v442_v25 = vld [vmem:[%s620_s3 + $0x20] sm:$0xff]  ;;  %v41_v27 = vld [vmem:[%s619_s0 + $0x68] sm:$0xff] }
   0x8   :  { %v40_v26 = vld [vmem:[%s619_s0 + $0x60] sm:$0xff]  ;;  %v441_v28 = vld [vmem:[%s620_s3 + $0x18] sm:$0xff]  ;;  %v440_v30 = vld [vmem:[%s620_s3 + $0x10] sm:$0xff] }
   0x9   :  { %v50_v29 = vpack.c.bf16 %v41_v27, %v40_v26  ;;  %v439_v31 = vld [vmem:[%s620_s3 + $0x8] sm:$0xff]  ;;  %v438_v32 = vld [vmem:[%s620_s3] sm:$0xff]  ;;  %v42_v33 = vld [vmem:[%s619_s0 + $0x70] sm:$0xff] }
   0xa   :  { %119 = vmatpush.bf16.msra.mxu0 %v435_v2  ;;  %255 = vmatpush.bf16.msra.mxu1 %v444_v23  ;;  %v43_v34 = vld [vmem:[%s619_s0 + $0x78] sm:$0xff]  ;;  %v454_v37 = vld [vmem:[%s618_s2] ss:$0 sm:$0xff] }
   0xb   :  { %447 = vmatpush.bf16.msra.mxu3 %v444_v23  ;;  %v51_v35 = vpack.c.bf16 %v43_v34, %v42_v33 }
   0xe   :  { %120 = vmatpush.bf16.msra.mxu0 %v434_v3  ;;  %256 = vmatpush.bf16.msra.mxu1 %v443_v24 }
   0xf   :  { %448 = vmatpush.bf16.msra.mxu3 %v443_v24 }
  0x11   :  { %393 = vmatmul.msk.bf16.vlgmr.msra.gmra.mxu0 %vm88_vm0, %v44_v6 }
  0x12   :  { %257 = vmatpush.bf16.msra.mxu1 %v442_v25 }
  0x13   :  { %449 = vmatpush.bf16.msra.mxu3 %v442_v25 }
  0x16   :  { %258 = vmatpush.bf16.msra.mxu1 %v441_v28 }
  0x17   :  { %450 = vmatpush.bf16.msra.mxu3 %v441_v28 }
  0x1a   :  { %259 = vmatpush.bf16.msra.mxu1 %v440_v30 }
  0x1b   :  { %451 = vmatpush.bf16.msra.mxu3 %v440_v30  ;;  %v455_v30 = vld [vmem:[%s621_s4] ss:$0 sm:$0xff] }
  0x1e   :  { %260 = vmatpush.bf16.msra.mxu1 %v439_v31 }
  0x1f   :  { %452 = vmatpush.bf16.msra.mxu3 %v439_v31 }
  0x21   :  { %394 = vmatmul.msk.bf16.gmra.mxu0 %vm88_vm0, %v45_v9 }
  0x22   :  { %261 = vmatpush.bf16.msra.mxu1 %v438_v32 }
  0x23   :  { %453 = vmatpush.bf16.msra.mxu3 %v438_v32 }
  0x31   :  { %395 = vmatmul.msk.bf16.gmra.mxu0 %vm88_vm0, %v46_v12 }
  0x41   :  { %396 = vmatmul.msk.bf16.gmra.mxu0 %vm88_vm0, %v47_v15 }
  0x51   :  { %397 = vmatmul.msk.bf16.gmra.mxu0 %vm88_vm0, %v48_v18 }
  0x61   :  { %398 = vmatmul.msk.bf16.gmra.mxu0 %vm88_vm0, %v49_v22 }
  0x71   :  { %399 = vmatmul.msk.bf16.gmra.mxu0 %vm88_vm0, %v50_v29 }
  0x81   :  { %400 = vmatmul.msk.bf16.gmra.mxu0 %vm88_vm0, %v51_v35 }
  0x8e   :  { %v122_v36 = vpop.f32.mrf.mxu0 }
  0x8f   :  { %v123_v38 = vadd.f32 %v454_v37, %v122_v36 }
  0x91   :  { %v162_v41 = vmax.f32 %v123_v38, 0.0 }
  0x96   :  { %v124_v39 = vpop.f32.mrf.mxu0 }
  0x97   :  { %v125_v40 = vadd.f32 %v454_v37, %v124_v39 }
  0x99   :  { %v163_v42 = vmax.f32 %v125_v40, 0.0 }
  0x9b   :  { %v178_v43 = vpack.c.bf16 %v163_v42, %v162_v41 }
  0x9d   :  { %262 = vmatmul.bf16.vlgmr.msra.gmra.mxu1 %v178_v43 }
  0x9e   :  { %v127_v44 = vpop.f32.mrf.mxu0 }
  0x9f   :  { %v128_v45 = vadd.f32 %v454_v37, %v127_v44 }
  0xa1   :  { %v164_v48 = vmax.f32 %v128_v45, 0.0 }
  0xa6   :  { %v129_v46 = vpop.f32.mrf.mxu0 }
  0xa7   :  { %v130_v47 = vadd.f32 %v454_v37, %v129_v46 }
  0xa9   :  { %v165_v49 = vmax.f32 %v130_v47, 0.0 }
  0xab   :  { %v179_v50 = vpack.c.bf16 %v165_v49, %v164_v48 }
  0xad   :  { %267 = vmatmul.bf16.gmra.mxu1 %v179_v50 }
  0xae   :  { %v132_v51 = vpop.f32.mrf.mxu0 }
  0xaf   :  { %v133_v52 = vadd.f32 %v454_v37, %v132_v51 }
  0xb1   :  { %v166_v55 = vmax.f32 %v133_v52, 0.0 }
  0xb6   :  { %v134_v53 = vpop.f32.mrf.mxu0 }
  0xb7   :  { %v135_v54 = vadd.f32 %v454_v37, %v134_v53 }
  0xb9   :  { %v167_v56 = vmax.f32 %v135_v54, 0.0 }
  0xbb   :  { %v180_v57 = vpack.c.bf16 %v167_v56, %v166_v55 }
  0xbd   :  { %272 = vmatmul.bf16.gmra.mxu1 %v180_v57 }
  0xbe   :  { %v137_v58 = vpop.f32.mrf.mxu0 }
  0xbf   :  { %v138_v59 = vadd.f32 %v454_v37, %v137_v58 }
  0xc1   :  { %v168_v62 = vmax.f32 %v138_v59, 0.0 }
  0xc6   :  { %v139_v60 = vpop.f32.mrf.mxu0 }
  0xc7   :  { %v140_v61 = vadd.f32 %v454_v37, %v139_v60 }
  0xc9   :  { %v169_v63 = vmax.f32 %v140_v61, 0.0 }
  0xcb   :  { %v181_v0 = vpack.c.bf16 %v169_v63, %v168_v62 }
  0xcd   :  { %277 = vmatmul.bf16.gmra.mxu1 %v181_v0 }
  0xce   :  { %v142_v1 = vpop.f32.mrf.mxu0 }
  0xcf   :  { %v143_v2 = vadd.f32 %v454_v37, %v142_v1 }
  0xd1   :  { %v170_v5 = vmax.f32 %v143_v2, 0.0 }
  0xd6   :  { %v144_v3 = vpop.f32.mrf.mxu0 }
  0xd7   :  { %v145_v4 = vadd.f32 %v454_v37, %v144_v3 }
  0xd9   :  { %v171_v6 = vmax.f32 %v145_v4, 0.0 }
  0xdb   :  { %v182_v7 = vpack.c.bf16 %v171_v6, %v170_v5 }
  0xdd   :  { %282 = vmatmul.bf16.gmra.mxu1 %v182_v7 }
  0xde   :  { %v147_v8 = vpop.f32.mrf.mxu0 }
  0xdf   :  { %v148_v9 = vadd.f32 %v454_v37, %v147_v8 }
  0xe1   :  { %v172_v12 = vmax.f32 %v148_v9, 0.0 }
  0xe6   :  { %v149_v10 = vpop.f32.mrf.mxu0 }
  0xe7   :  { %v150_v11 = vadd.f32 %v454_v37, %v149_v10 }
  0xe9   :  { %v173_v13 = vmax.f32 %v150_v11, 0.0 }
  0xeb   :  { %v183_v14 = vpack.c.bf16 %v173_v13, %v172_v12 }
  0xed   :  { %287 = vmatmul.bf16.vlgmr.msra.gmra.mxu3 %v183_v14 }
  0xee   :  { %v152_v15 = vpop.f32.mrf.mxu0 }
  0xef   :  { %v153_v16 = vadd.f32 %v454_v37, %v152_v15 }
  0xf1   :  { %v174_v19 = vmax.f32 %v153_v16, 0.0 }
  0xf6   :  { %v154_v17 = vpop.f32.mrf.mxu0 }
  0xf7   :  { %v155_v18 = vadd.f32 %v454_v37, %v154_v17 }
  0xf9   :  { %v175_v20 = vmax.f32 %v155_v18, 0.0 }
  0xfb   :  { %v184_v21 = vpack.c.bf16 %v175_v20, %v174_v19 }
  0xfd   :  { %292 = vmatmul.bf16.gmra.mxu3 %v184_v21 }
  0xfe   :  { %v157_v22 = vpop.f32.mrf.mxu0 }
  0xff   :  { %v158_v23 = vadd.f32 %v454_v37, %v157_v22 }
 0x101   :  { %v176_v26 = vmax.f32 %v158_v23, 0.0 }
 0x106   :  { %v159_v24 = vpop.f32.mrf.mxu0 }
 0x107   :  { %v160_v25 = vadd.f32 %v454_v37, %v159_v24 }
 0x109   :  { %v177_v27 = vmax.f32 %v160_v25, 0.0 }
 0x10b   :  { %v185_v28 = vpack.c.bf16 %v177_v27, %v176_v26 }
 0x10d   :  { %297 = vmatmul.bf16.gmra.mxu3 %v185_v28 }
 0x11a   :  { %v263_v29 = vpop.f32.mrf.mxu1 }
 0x11b   :  { %v264_v31 = vadd.f32 %v455_v30, %v263_v29 }
 0x11d   :  { %v303_v34 = vmax.f32 %v264_v31, 0.0  ;;  %v369_v31 = vstv %s623_s6 }
 0x122   :  { %v265_v32 = vpop.f32.mrf.mxu1 }
 0x123   :  { %v266_v33 = vadd.f32 %v455_v30, %v265_v32 }
 0x125   :  { %v304_v35 = vmax.f32 %v266_v33, 0.0 }
 0x127   :  { %v596_v36 = vpack.c.bf16 %v304_v35, %v303_v34 }
 0x129   :  { %v332_v29 = vsel %vm88_vm0, %v596_v36, 0 }
 0x12a   :  { %v268_v38 = vpop.f32.mrf.mxu1 }
 0x12b   :  { %v269_v39 = vadd.f32 %v455_v30, %v268_v38 }
 0x12d   :  { %v305_v41 = vmax.f32 %v269_v39, 0.0 }
 0x132   :  { %v270_v40 = vpop.f32.mrf.mxu1 }
 0x133   :  { %v271_v37 = vadd.f32 %v455_v30, %v270_v40 }
 0x135   :  { %v306_v42 = vmax.f32 %v271_v37, 0.0 }
 0x137   :  { %v321_v43 = vpack.c.bf16 %v306_v42, %v305_v41 }
 0x139   :  { %v335_v28 = vsel %vm88_vm0, %v321_v43, 0 }
 0x13a   :  { %v273_v45 = vpop.f32.mrf.mxu1 }
 0x13b   :  { %v274_v22 = vadd.f32 %v455_v30, %v273_v45 }
 0x13d   :  { %v307_v25 = vmax.f32 %v274_v22, 0.0 }
 0x142   :  { %v275_v47 = vpop.f32.mrf.mxu1 }
 0x143   :  { %v276_v20 = vadd.f32 %v455_v30, %v275_v47 }
 0x145   :  { %v308_v23 = vmax.f32 %v276_v20, 0.0 }
 0x147   :  { %v322_v26 = vpack.c.bf16 %v308_v23, %v307_v25 }
 0x149   :  { %v338_v27 = vsel %vm88_vm0, %v322_v26, 0 }
 0x14a   :  { %v278_v50 = vpop.f32.mrf.mxu1 }
 0x14b   :  { %v279_v16 = vadd.f32 %v455_v30, %v278_v50 }
 0x14d   :  { %v309_v19 = vmax.f32 %v279_v16, 0.0 }
 0x152   :  { %v280_v52 = vpop.f32.mrf.mxu1 }
 0x153   :  { %v281_v14 = vadd.f32 %v455_v30, %v280_v52 }
 0x155   :  { %v310_v17 = vmax.f32 %v281_v14, 0.0 }
 0x157   :  { %v323_v21 = vpack.c.bf16 %v310_v17, %v309_v19 }
 0x159   :  { %v341_v24 = vsel %vm88_vm0, %v323_v21, 0 }
 0x15a   :  { %v283_v61 = vpop.f32.mrf.mxu1 }
 0x15b   :  { %v284_v10 = vadd.f32 %v455_v30, %v283_v61 }
 0x15d   :  { %v311_v13 = vmax.f32 %v284_v10, 0.0 }
 0x162   :  { %v285_v6 = vpop.f32.mrf.mxu1 }
 0x163   :  { %v286_v8 = vadd.f32 %v455_v30, %v285_v6 }
 0x165   :  { %v312_v11 = vmax.f32 %v286_v8, 0.0 }
 0x167   :  { %v324_v15 = vpack.c.bf16 %v312_v11, %v311_v13 }
 0x169   :  { %v344_v18 = vsel %vm88_vm0, %v324_v15, 0 }
 0x170   :  { %v288_v44 = vpop.f32.mrf.mxu3 }
 0x171   :  { %v289_v3 = vadd.f32 %v455_v30, %v288_v44 }
 0x173   :  { %v313_v7 = vmax.f32 %v289_v3, 0.0 }
 0x178   :  { %v290_v46 = vpop.f32.mrf.mxu3 }
 0x179   :  { %v291_v1 = vadd.f32 %v455_v30, %v290_v46 }
 0x17b   :  { %v314_v4 = vmax.f32 %v291_v1, 0.0 }
 0x17d   :  { %v325_v9 = vpack.c.bf16 %v314_v4, %v313_v7 }
 0x17f   :  { %v347_v12 = vsel %vm88_vm0, %v325_v9, 0 }
 0x180   :  { %v293_v48 = vpop.f32.mrf.mxu3 }
 0x181   :  { %v294_v59 = vadd.f32 %v455_v30, %v293_v48 }
 0x183   :  { %v315_v0 = vmax.f32 %v294_v59, 0.0 }
 0x188   :  { %v295_v49 = vpop.f32.mrf.mxu3 }
 0x189   :  { %v296_v56 = vadd.f32 %v455_v30, %v295_v49 }
 0x18b   :  { %v316_v62 = vmax.f32 %v296_v56, 0.0 }
 0x18d   :  { %v326_v2 = vpack.c.bf16 %v316_v62, %v315_v0 }
 0x18f   :  { %v350_v5 = vsel %vm88_vm0, %v326_v2, 0 }
 0x190   :  { %v298_v51 = vpop.f32.mrf.mxu3 }
 0x191   :  { %v299_v53 = vadd.f32 %v455_v30, %v298_v51 }
 0x193   :  { %v317_v57 = vmax.f32 %v299_v53, 0.0 }
 0x198   :  { %v300_v54 = vpop.f32.mrf.mxu3 }
 0x199   :  { %v301_v55 = vadd.f32 %v455_v30, %v300_v54  ;;  %v319_v30 = vld [vmem:[%s622_s5] sm:$0xf] }
 0x19b   :  { %v318_v58 = vmax.f32 %v301_v55, 0.0 }
 0x19d   :  { %v327_v60 = vpack.c.bf16 %v318_v58, %v317_v57 }
 0x19f   :  { %v353_v63 = vsel %vm88_vm0, %v327_v60, 0 }
 0x1a0   :  { %355 = vmatpush.bf16.xpose.msra.mxu2 %v353_v63 }
 0x1a8   :  { %356 = vmatpush.bf16.xpose.msra.mxu2 %v350_v5 }
 0x1b0   :  { %357 = vmatpush.bf16.xpose.msra.mxu2 %v347_v12 }
 0x1b8   :  { %358 = vmatpush.bf16.xpose.msra.mxu2 %v344_v18 }
 0x1c0   :  { %359 = vmatpush.bf16.xpose.msra.mxu2 %v341_v24 }
 0x1c8   :  { %360 = vmatpush.bf16.xpose.msra.mxu2 %v338_v27 }
 0x1d0   :  { %361 = vmatpush.bf16.xpose.msra.mxu2 %v335_v28 }
 0x1d8   :  { %362 = vmatpush.bf16.xpose.msra.mxu2 %v332_v29 }
 0x1df   :  { %433 = vmatmul.msk.bf16.vlgmr.msra.gmra.mxu2 %vm88_vm0, %v319_v30 }
 0x262   :  { %v364_v32 = vpop.f32.mrf.mxu2 }
 0x263   :  { %v370_v33 = vadd.f32 %v369_v31, %v364_v32 }
 0x265   :  { %456 = vtanh.f32 %v370_v33 }
 0x26a   :  { %v366_v34 = vpop.f32.mrf.mxu2 }
 0x26b   :  { %v457_v35 = vpop.eup %456 }
 0x26c   :  { %372 = vst [vmem:[%s624_s7] sm:$0x1] %v457_v35 }

</bundles_post_ra>
